<compile_context>
chip_gen: v5e
topology: v5e:2x2
jax: 0.10.0
libtpu: 0.0.40
codegen_flags: <defaults>
</compile_context>

<pallas_src>
import functools

import jax
import jax.numpy as jnp
from jax.experimental import pallas as pl
from jax.experimental.pallas import tpu as pltpu

_LANE = 128
_SUB = 8
_MAX_SUB_ROWS = 512          # rows per inner sub-slice (~256 KiB f32 temps)


def _cdiv(a: int, b: int) -> int:
    return -(-a // b)


def _pick_sub_rows(br: int) -> int:
    """Largest sub-slice row count that divides the block row count."""
    if br <= _MAX_SUB_ROWS:
        return br
    for cand in (_MAX_SUB_ROWS, 256, 128, 64, 32, 16, 8):
        if br % cand == 0:
            return cand
    return _SUB


def _dice_bce_kernel(p_ref, t_ref, out_ref, inter_acc, pt_acc, bce_acc, *,
                     block_rows: int, sub_rows: int, n_sub: int, rows: int,
                     blocks_per_split: int, mask_needed: bool):
    j = pl.program_id(1)                      # reduction axis (inner)

    @pl.when(j == 0)
    def _():
        inter_acc[...] = jnp.zeros_like(inter_acc)
        pt_acc[...] = jnp.zeros_like(pt_acc)
        bce_acc[...] = jnp.zeros_like(bce_acc)

    def _fold(x):                              # (sub_rows,128) -> (8,128), VPU adds
        return jnp.sum(x.reshape(-1, _SUB, _LANE), axis=0)

    def _accumulate(row_off=None):
        def body(i, carry):
            if n_sub == 1:
                r0 = 0
                p = p_ref[...]
                t = t_ref[...]
            else:
                r0 = pl.multiple_of(i * sub_rows, sub_rows)
                p = p_ref[pl.ds(r0, sub_rows), :]
                t = t_ref[pl.ds(r0, sub_rows), :]
            p = p.astype(jnp.float32)
            t = t.astype(jnp.float32)
            if row_off is not None:
                # Mask rows past the (padded) array end; garbage in the
                # OOB/duplicated region is zeroed before any arithmetic.
                ri = jax.lax.broadcasted_iota(jnp.int32, p.shape, 0)
                valid = (ri + (row_off + r0)) < rows
                p = jnp.where(valid, p, 0.0)
                t = jnp.where(valid, t, 0.0)
            # PyTorch binary_cross_entropy semantics: log terms clamped at
            # -100, so p = t = 0 (zero padding) contributes exactly 0.  The
            # leading minus sign of BCE is hoisted into the JAX epilogue.
            logp = jnp.maximum(jnp.log(p), -100.0)
            log1mp = jnp.maximum(jnp.log(1.0 - p), -100.0)
            nbce = log1mp + t * (logp - log1mp)
            inter_acc[...] += _fold(p * t)
            pt_acc[...] += _fold(p + t)
            bce_acc[...] += _fold(nbce)
            return carry

        if n_sub == 1:
            body(0, 0)
        else:
            jax.lax.fori_loop(0, n_sub, body, 0)

    if mask_needed:
        s = pl.program_id(0)
        row_off = (s * blocks_per_split + j) * block_rows
        block_is_full = row_off + block_rows <= rows

        @pl.when(block_is_full)
        def _():
            _accumulate()

        @pl.when(jnp.logical_not(block_is_full))
        def _():
            _accumulate(row_off)
    else:
        _accumulate()

    @pl.when(j == pl.num_programs(1) - 1)
    def _():
        out_ref[0 * _SUB:1 * _SUB, :] = inter_acc[...]
        out_ref[1 * _SUB:2 * _SUB, :] = pt_acc[...]
        out_ref[2 * _SUB:3 * _SUB, :] = bce_acc[...]


def dice_bce_loss(inputs: jax.Array, targets: jax.Array, smooth: float = 1.0,
                  *, block_rows: int = 8192, num_splits: int = 1) -> jax.Array:
    """JAX/Pallas equivalent of DiceBCELoss.forward. Returns an f32 scalar.

    Inputs may be f32/bf16/int8 etc.; they are upcast to f32 in-register
    inside the kernel (no extra HBM pass in the wrapper).
    """
    p = inputs.reshape(-1)
    t = targets.reshape(-1)
    n = int(p.shape[0])
    assert n == int(t.shape[0]) and n > 0

    # Minimum sublane multiple for the packed dtype (f32 -> 8, bf16 -> 16,
    # int8 -> 32); pad the flat length so the (rows, 128) view tiles cleanly
    # for both inputs.  Padded elements are exact zeros and contribute exactly
    # 0 to every partial sum, so they need no in-kernel masking.
    def _sub_mult(dt):
        return max(_SUB, 32 // jnp.dtype(dt).itemsize)

    sm = max(_sub_mult(p.dtype), _sub_mult(t.dtype))
    tile = sm * _LANE
    n_pad = (-n) % tile
    if n_pad:
        p = jnp.pad(p, (0, n_pad))
        t = jnp.pad(t, (0, n_pad))
    rows = (n + n_pad) // _LANE               # multiple of sm (>= 8)

    br = min(int(block_rows), rows)
    if br != rows:                            # keep block a sublane multiple
        br = max(sm, br - br % sm)
    sub_rows = _pick_sub_rows(br)
    n_sub = br // sub_rows

    total_blocks = _cdiv(rows, br)
    ns = max(1, min(int(num_splits), total_blocks))
    bps = _cdiv(total_blocks, ns)
    # Mask only blocks whose logical row range extends past `rows` (the
    # partial edge block and/or clamped duplicate blocks).
    mask_needed = (ns * bps * br != rows)

    p2 = p.reshape(rows, _LANE)
    t2 = t.reshape(rows, _LANE)

    if ns * bps > total_blocks:
        # Some (split, block) pairs land past the end: clamp the block index;
        # their contribution is masked to zero inside the kernel.
        def imap(s, j):
            return (jnp.minimum(s * bps + j, total_blocks - 1), 0)
    else:
        def imap(s, j):
            return (s * bps + j, 0)

    kernel = functools.partial(
        _dice_bce_kernel, block_rows=br, sub_rows=sub_rows, n_sub=n_sub,
        rows=rows, blocks_per_split=int(bps), mask_needed=bool(mask_needed))

    out = pl.pallas_call(
        kernel,
        out_shape=jax.ShapeDtypeStruct((ns * 3 * _SUB, _LANE), jnp.float32),
        grid_spec=pltpu.PrefetchScalarGridSpec(
            num_scalar_prefetch=0,
            grid=(ns, bps),
            in_specs=[pl.BlockSpec((br, _LANE), imap),
                      pl.BlockSpec((br, _LANE), imap)],
            out_specs=pl.BlockSpec((3 * _SUB, _LANE), lambda s, j: (s, 0)),
            scratch_shapes=[pltpu.VMEM((_SUB, _LANE), jnp.float32)] * 3,
        ),
        compiler_params=pltpu.CompilerParams(
            dimension_semantics=("parallel", "arbitrary"),
            vmem_limit_bytes=32 * 1024 * 1024),
    )(p2, t2)

    # Tiny scalar epilogue: combine per-split lane-dense partials.
    parts = out.reshape(ns, 3, _SUB, _LANE)
    inter = jnp.sum(parts[:, 0])
    pt_sum = jnp.sum(parts[:, 1])
    bce_mean = -jnp.sum(parts[:, 2]) / n      # hoisted BCE negation
    dice_loss = 1.0 - (2.0 * inter + smooth) / (pt_sum + smooth)
    return bce_mean + dice_loss


def _reference(inputs, targets, smooth=1.0):
    p = inputs.reshape(-1).astype(jnp.float32)
    t = targets.reshape(-1).astype(jnp.float32)
    inter = jnp.sum(p * t)
    dice = 1.0 - (2.0 * inter + smooth) / (jnp.sum(p) + jnp.sum(t) + smooth)
    logp = jnp.maximum(jnp.log(p), -100.0)
    log1mp = jnp.maximum(jnp.log(1.0 - p), -100.0)
    bce = jnp.mean(-(t * logp + (1.0 - t) * log1mp))
    return bce + dice


if __name__ == "__main__":
    key = jax.random.PRNGKey(0)
    k1, k2, k3, k4 = jax.random.split(key, 4)

    def _check(got, want, name, tol=1e-5):
        got = jax.block_until_ready(got)
        assert jnp.allclose(got, want, rtol=tol, atol=tol), (name, got, want)

    # NCHW, like the PyTorch usage (segmentation probabilities + binary masks).
    x = jax.nn.sigmoid(jax.random.normal(k1, (2, 4, 16, 16), jnp.float32))
    y = (jax.random.uniform(k2, (2, 4, 16, 16)) > 0.5).astype(jnp.float32)
    ref = _reference(x, y)

    # 1) Default config: one full-array block, no masking.
    _check(dice_bce_loss(x, y), ref, "default")

    # 2) Multi-block reduction axis.
    _check(dice_bce_loss(x, y, block_rows=8), ref, "multi-block")

    # 3) Two splits with a clamped duplicate block (parallel axis + mask path).
    x3 = jax.nn.sigmoid(jax.random.normal(k3, (1, 1, 40, 128), jnp.float32))
    y3 = (jax.random.uniform(k4, (1, 1, 40, 128)) > 0.5).astype(jnp.float32)
    ref3 = _reference(x3, y3)
    _check(dice_bce_loss(x3, y3, block_rows=8, num_splits=2), ref3,
           "clamped-split")

    # 4) Partial edge block (row-masking of the OOB tail of the last block).
    _check(dice_bce_loss(x3, y3, block_rows=16), ref3, "edge-block")

    # 5) Ragged element count: zero padding only, no in-kernel mask.
    x5 = jax.nn.sigmoid(jax.random.normal(k3, (1, 1, 10, 10), jnp.float32))
    y5 = (jax.random.uniform(k4, (1, 1, 10, 10)) > 0.5).astype(jnp.float32)
    _check(dice_bce_loss(x5, y5), _reference(x5, y5), "ragged")

    # 6) bf16 inputs, upcast in-register inside the kernel (no wrapper cast).
    xb = x.astype(jnp.bfloat16)
    yb = y.astype(jnp.bfloat16)
    _check(dice_bce_loss(xb, yb), _reference(xb, yb), "bf16", tol=1e-4)

    print("KERNEL_OK")
</pallas_src>

<mosaic_0001>
module attributes {stable_mosaic.version = 11 : i64} {
  func.func @_dice_bce_kernel(%arg0: i32, %arg1: i32, %arg2: memref<16x128xf32, #tpu.memory_space<vmem>>, %arg3: memref<16x128xf32, #tpu.memory_space<vmem>>, %arg4: memref<24x128xf32, #tpu.memory_space<vmem>>, %arg5: memref<8x128xf32, #tpu.memory_space<vmem>>, %arg6: memref<8x128xf32, #tpu.memory_space<vmem>>, %arg7: memref<8x128xf32, #tpu.memory_space<vmem>>) attributes {dimension_semantics = [#tpu.dimension_semantics<parallel>, #tpu.dimension_semantics<arbitrary>], iteration_bounds = array<i64: 1, 1>, scalar_prefetch = 0 : i64, scratch_operands = 3 : i64, tpu.core_type = #tpu.core_type<tc>, window_params = [{transform_indices = @transform_0, window_bounds = array<i64: 16, 128>}, {transform_indices = @transform_1, window_bounds = array<i64: 16, 128>}, {transform_indices = @transform_2, window_bounds = array<i64: 24, 128>}]} {
    %c0_i32 = arith.constant 0 : i32
    %0 = arith.cmpi eq, %arg1, %c0_i32 : i32
    %1 = arith.extui %0 : i1 to i32
    %c0_i32_0 = arith.constant 0 : i32
    %2 = arith.cmpi ne, %1, %c0_i32_0 : i32
    scf.if %2 {
      %cst_23 = arith.constant 0.000000e+00 : f32
      %36 = vector.broadcast %cst_23 : f32 to vector<8x128xf32>
      %c0_24 = arith.constant 0 : index
      %c0_25 = arith.constant 0 : index
      %37 = vector.load %arg5[%c0_24, %c0_25] : memref<8x128xf32, #tpu.memory_space<vmem>>, vector<8x128xf32>
      tpu.vector_store %arg5[%c0_24, %c0_25], %36 {strides = array<i32>} : memref<8x128xf32, #tpu.memory_space<vmem>>, vector<8x128xf32>,
      %cst_26 = arith.constant 0.000000e+00 : f32
      %38 = vector.broadcast %cst_26 : f32 to vector<8x128xf32>
      %c0_27 = arith.constant 0 : index
      %c0_28 = arith.constant 0 : index
      %39 = vector.load %arg6[%c0_27, %c0_28] : memref<8x128xf32, #tpu.memory_space<vmem>>, vector<8x128xf32>
      tpu.vector_store %arg6[%c0_27, %c0_28], %38 {strides = array<i32>} : memref<8x128xf32, #tpu.memory_space<vmem>>, vector<8x128xf32>,
      %cst_29 = arith.constant 0.000000e+00 : f32
      %40 = vector.broadcast %cst_29 : f32 to vector<8x128xf32>
      %c0_30 = arith.constant 0 : index
      %c0_31 = arith.constant 0 : index
      %41 = vector.load %arg7[%c0_30, %c0_31] : memref<8x128xf32, #tpu.memory_space<vmem>>, vector<8x128xf32>
      tpu.vector_store %arg7[%c0_30, %c0_31], %40 {strides = array<i32>} : memref<8x128xf32, #tpu.memory_space<vmem>>, vector<8x128xf32>,
    } else {
    }
    %c0 = arith.constant 0 : index
    %c0_1 = arith.constant 0 : index
    %3 = vector.load %arg2[%c0, %c0_1] : memref<16x128xf32, #tpu.memory_space<vmem>>, vector<16x128xf32>
    %c0_2 = arith.constant 0 : index
    %c0_3 = arith.constant 0 : index
    %4 = vector.load %arg3[%c0_2, %c0_3] : memref<16x128xf32, #tpu.memory_space<vmem>>, vector<16x128xf32>
    %5 = math.log %3 : vector<16x128xf32>
    %cst = arith.constant -1.000000e+02 : f32
    %6 = vector.broadcast %cst : f32 to vector<16x128xf32>
    %7 = arith.maximumf %5, %6 : vector<16x128xf32>
    %cst_4 = arith.constant 1.000000e+00 : f32
    %8 = vector.broadcast %cst_4 : f32 to vector<16x128xf32>
    %9 = arith.subf %8, %3 : vector<16x128xf32>
    %10 = math.log %9 : vector<16x128xf32>
    %cst_5 = arith.constant -1.000000e+02 : f32
    %11 = vector.broadcast %cst_5 : f32 to vector<16x128xf32>
    %12 = arith.maximumf %10, %11 : vector<16x128xf32>
    %13 = arith.subf %7, %12 : vector<16x128xf32>
    %14 = arith.mulf %4, %13 : vector<16x128xf32>
    %15 = arith.addf %12, %14 : vector<16x128xf32>
    %c0_6 = arith.constant 0 : index
    %c0_7 = arith.constant 0 : index
    %16 = vector.load %arg5[%c0_6, %c0_7] : memref<8x128xf32, #tpu.memory_space<vmem>>, vector<8x128xf32>
    %17 = arith.mulf %3, %4 : vector<16x128xf32>
    %18 = vector.shape_cast %17 : vector<16x128xf32> to vector<2x8x128xf32>
    %cst_8 = arith.constant dense<0.000000e+00> : vector<8x128xf32>
    %19 = vector.multi_reduction <add>, %18, %cst_8 [0] : vector<2x8x128xf32> to vector<8x128xf32>
    %20 = arith.addf %16, %19 : vector<8x128xf32>
    %c0_9 = arith.constant 0 : index
    %c0_10 = arith.constant 0 : index
    %21 = vector.load %arg5[%c0_9, %c0_10] : memref<8x128xf32, #tpu.memory_space<vmem>>, vector<8x128xf32>
    tpu.vector_store %arg5[%c0_9, %c0_10], %20 {strides = array<i32>} : memref<8x128xf32, #tpu.memory_space<vmem>>, vector<8x128xf32>,
    %c0_11 = arith.constant 0 : index
    %c0_12 = arith.constant 0 : index
    %22 = vector.load %arg6[%c0_11, %c0_12] : memref<8x128xf32, #tpu.memory_space<vmem>>, vector<8x128xf32>
    %23 = arith.addf %3, %4 : vector<16x128xf32>
    %24 = vector.shape_cast %23 : vector<16x128xf32> to vector<2x8x128xf32>
    %cst_13 = arith.constant dense<0.000000e+00> : vector<8x128xf32>
    %25 = vector.multi_reduction <add>, %24, %cst_13 [0] : vector<2x8x128xf32> to vector<8x128xf32>
    %26 = arith.addf %22, %25 : vector<8x128xf32>
    %c0_14 = arith.constant 0 : index
    %c0_15 = arith.constant 0 : index
    %27 = vector.load %arg6[%c0_14, %c0_15] : memref<8x128xf32, #tpu.memory_space<vmem>>, vector<8x128xf32>
    tpu.vector_store %arg6[%c0_14, %c0_15], %26 {strides = array<i32>} : memref<8x128xf32, #tpu.memory_space<vmem>>, vector<8x128xf32>,
    %c0_16 = arith.constant 0 : index
    %c0_17 = arith.constant 0 : index
    %28 = vector.load %arg7[%c0_16, %c0_17] : memref<8x128xf32, #tpu.memory_space<vmem>>, vector<8x128xf32>
    %29 = vector.shape_cast %15 : vector<16x128xf32> to vector<2x8x128xf32>
    %cst_18 = arith.constant dense<0.000000e+00> : vector<8x128xf32>
    %30 = vector.multi_reduction <add>, %29, %cst_18 [0] : vector<2x8x128xf32> to vector<8x128xf32>
    %31 = arith.addf %28, %30 : vector<8x128xf32>
    %c0_19 = arith.constant 0 : index
    %c0_20 = arith.constant 0 : index
    %32 = vector.load %arg7[%c0_19, %c0_20] : memref<8x128xf32, #tpu.memory_space<vmem>>, vector<8x128xf32>
    tpu.vector_store %arg7[%c0_19, %c0_20], %31 {strides = array<i32>} : memref<8x128xf32, #tpu.memory_space<vmem>>, vector<8x128xf32>,
    %c0_i32_21 = arith.constant 0 : i32
    %33 = arith.cmpi eq, %arg1, %c0_i32_21 : i32
    %34 = arith.extui %33 : i1 to i32
    %c0_i32_22 = arith.constant 0 : i32
    %35 = arith.cmpi ne, %34, %c0_i32_22 : i32
    scf.if %35 {
      %c0_23 = arith.constant 0 : index
      %c0_24 = arith.constant 0 : index
      %36 = vector.load %arg5[%c0_23, %c0_24] : memref<8x128xf32, #tpu.memory_space<vmem>>, vector<8x128xf32>
      %c0_25 = arith.constant 0 : index
      %c0_26 = arith.constant 0 : index
      %37 = vector.load %arg4[%c0_25, %c0_26] : memref<24x128xf32, #tpu.memory_space<vmem>>, vector<8x128xf32>
      tpu.vector_store %arg4[%c0_25, %c0_26], %36 {strides = array<i32>} : memref<24x128xf32, #tpu.memory_space<vmem>>, vector<8x128xf32>,
      %c0_27 = arith.constant 0 : index
      %c0_28 = arith.constant 0 : index
      %38 = vector.load %arg6[%c0_27, %c0_28] : memref<8x128xf32, #tpu.memory_space<vmem>>, vector<8x128xf32>
      %c8 = arith.constant 8 : index
      %c0_29 = arith.constant 0 : index
      %39 = vector.load %arg4[%c8, %c0_29] : memref<24x128xf32, #tpu.memory_space<vmem>>, vector<8x128xf32>
      tpu.vector_store %arg4[%c8, %c0_29], %38 {strides = array<i32>} : memref<24x128xf32, #tpu.memory_space<vmem>>, vector<8x128xf32>,
      %c0_30 = arith.constant 0 : index
      %c0_31 = arith.constant 0 : index
      %40 = vector.load %arg7[%c0_30, %c0_31] : memref<8x128xf32, #tpu.memory_space<vmem>>, vector<8x128xf32>
      %c16 = arith.constant 16 : index
      %c0_32 = arith.constant 0 : index
      %41 = vector.load %arg4[%c16, %c0_32] : memref<24x128xf32, #tpu.memory_space<vmem>>, vector<8x128xf32>
      tpu.vector_store %arg4[%c16, %c0_32], %40 {strides = array<i32>} : memref<24x128xf32, #tpu.memory_space<vmem>>, vector<8x128xf32>,
    } else {
    }
    return
  }
  func.func @transform_0(%arg0: i32, %arg1: i32) -> (i32, i32) {
    %c1_i32 = arith.constant 1 : i32
    %0 = arith.muli %arg0, %c1_i32 : i32
    %1 = arith.addi %0, %arg1 : i32
    %c0_i32 = arith.constant 0 : i32
    %c0_i32_0 = arith.constant 0 : i32
    return %1, %c0_i32 : i32, i32
  }
  func.func @transform_1(%arg0: i32, %arg1: i32) -> (i32, i32) {
    %c1_i32 = arith.constant 1 : i32
    %0 = arith.muli %arg0, %c1_i32 : i32
    %1 = arith.addi %0, %arg1 : i32
    %c0_i32 = arith.constant 0 : i32
    %c0_i32_0 = arith.constant 0 : i32
    return %1, %c0_i32 : i32, i32
  }
  func.func @transform_2(%arg0: i32, %arg1: i32) -> (i32, i32) {
    %c0_i32 = arith.constant 0 : i32
    %c0_i32_0 = arith.constant 0 : i32
    return %arg0, %c0_i32 : i32, i32
  }
}

</mosaic_0001>

<bundles_post_ra>
// kernel: tpu_custom_call.1
= control target key start
LH: loop header
LB: loop body
LE: loop exit
PB: predicated region body
PF: predicated region fallthrough
CT: control target
= control target key end

     0   :  { %7 = vsyncpa [#allocation6], 0  ;;  %s261_s0 = inlined_call_operand.hbm [shape: f32[16,128], index: 0, kind: input, shape index: {}]   ;;  %s262_s1 = inlined_call_operand.hbm [shape: f32[16,128], index: 1, kind: input, shape index: {}]   ;;  %s263_s2 = inlined_call_operand.hbm [shape: f32[24,128], index: 2, kind: output, shape index: {}]  }
   0x1   :  { %8 = vsyncpa [#allocation9], 0 }
   0x2   :  { %9 = vsyncpa [#allocation7], 0  ;;  %s18_s11 = sshll.u32 %s261_s0, 4  ;;  %s223_s12 = smov [#allocation5]   ;;  %s19_s11 = int_to_ptr.hbm [resolvable:$true] %s18_s11 }
   0x3   :  { %s20_s13 = sshll.u32 %s223_s12, 4  ;;  %s35_s16 = sshll.u32 %s262_s1, 4  ;;  %s21_s13 = int_to_ptr.vmem [resolvable:$true] %s20_s13  ;;  %s36_s16 = int_to_ptr.hbm [resolvable:$true] %s35_s16 }
   0x4   :  { %s224_s17 = smov 128   ;;  %s225_s18 = smov 8  }
   0x5   :  { %26 = dma.hbm_to_vmem [thread:$0]  %s19_s11, 256, %s21_s13, [#allocation6], %s224_s17, %s224_s17, %s225_s18  }
   0x6   :  { %s226_s19 = smov [#allocation8]  }
   0x7   :  { %s37_s20 = sshll.u32 %s226_s19, 4  ;;  %s38_s20 = int_to_ptr.vmem [resolvable:$true] %s37_s20 }
   0x8   :  { %43 = dma.hbm_to_vmem [thread:$0]  %s36_s16, 256, %s38_s20, [#allocation9], %s224_s17, %s224_s17, %s225_s18  }
   0x9   :  { %217 = dma.done.wait [#allocation6], 256  }
   0xa   :  { %218 = vsyncadd [#allocation6], 4294967040 }
   0xb   :  { %219 = dma.done.wait [#allocation9], 256  }
   0xc   :  { %220 = vsyncadd [#allocation9], 4294967040  ;;  %v63_v0 = vld [vmem:[#allocation5] sm:$0xff]  ;;  %v64_v1 = vld [vmem:[#allocation5 + $0x8] sm:$0xff]  ;;  %s227_s0 = smov [#allocation10]   ;;  %s118_s23 = sshll.u32 %s263_s2, 4  ;;  %s119_s23 = int_to_ptr.hbm [resolvable:$true] %s118_s23 }
   0xd   :  { %v65_v2 = vld [vmem:[#allocation8] sm:$0xff]  ;;  %v66_v3 = vld [vmem:[#allocation8 + $0x8] sm:$0xff]  ;;  %137 = vlog2.f32 %v63_v0  ;;  %v73_v6 = vsub.f32 1.0, %v63_v0  ;;  %v74_v9 = vsub.f32 1.0, %v64_v1  ;;  %s116_s1 = sshll.u32 %s227_s0, 4  ;;  %s117_s1 = int_to_ptr.vmem [resolvable:$true] %s116_s1 }
   0xe   :  { %v88_v4 = vmul.f32 %v65_v2, %v63_v0  ;;  %v94_v5 = vadd.f32 %v65_v2, %v63_v0  ;;  %139 = vlog2.f32 %v64_v1  ;;  %v89_v7 = vmul.f32 %v66_v3, %v64_v1 }
   0xf   :  { %v95_v8 = vadd.f32 %v66_v3, %v64_v1  ;;  %141 = vlog2.f32 %v73_v6 }
  0x10   :  { %v90_v10 = vadd.f32 %v89_v7, %v88_v4  ;;  %143 = vlog2.f32 %v74_v9 }
  0x11   :  { %v96_v11 = vadd.f32 %v95_v8, %v94_v5 }
  0x12   :  { %107 = vst [vmem:[#allocation10] sm:$0xff] %v90_v10 }
  0x13   :  { %v138_v12 = vpop.eup %137  ;;  %109 = vst [vmem:[#allocation10 + $0x8] sm:$0xff] %v96_v11 }
  0x14   :  { %v140_v13 = vpop.eup %139  ;;  %v68_v14 = vmul.f32 0.6931472, %v138_v12 }
  0x15   :  { %v142_v15 = vpop.eup %141  ;;  %v70_v16 = vmul.f32 0.6931472, %v140_v13 }
  0x16   :  { %v144_v17 = vpop.eup %143  ;;  %v71_v18 = vmax.f32 %v68_v14, -100.0  ;;  %v76_v19 = vmul.f32 0.6931472, %v142_v15 }
  0x17   :  { %v72_v20 = vmax.f32 %v70_v16, -100.0  ;;  %v78_v21 = vmul.f32 0.6931472, %v144_v17 }
  0x18   :  { %v79_v22 = vmax.f32 %v76_v19, -100.0 }
  0x19   :  { %v80_v23 = vmax.f32 %v78_v21, -100.0 }
  0x1a   :  { %v81_v24 = vsub.f32 %v71_v18, %v79_v22 }
  0x1b   :  { %v82_v25 = vsub.f32 %v72_v20, %v80_v23 }
  0x1c   :  { %v83_v26 = vmul.f32 %v81_v24, %v65_v2 }
  0x1d   :  { %v84_v27 = vmul.f32 %v82_v25, %v66_v3 }
  0x1e   :  { %v85_v28 = vadd.f32 %v83_v26, %v79_v22 }
  0x1f   :  { %v86_v29 = vadd.f32 %v84_v27, %v80_v23 }
  0x21   :  { %v100_v30 = vadd.f32 %v86_v29, %v85_v28 }
  0x23   :  { %111 = vst [vmem:[#allocation10 + $0x10] sm:$0xff] %v100_v30 }
  0x24   :  { %124 = dma.vmem_to_hbm [thread:$0]  %s117_s1, 384, %s119_s23, [#allocation7], %s224_s17, %s224_s17, %s225_s18  }
  0x25   :  { %221 = dma.done.wait [#allocation7], 384  }
  0x26   :  { %222 = vsyncadd [#allocation7], 4294966912 }
  0x27   :  { %129 = vsyncpa [#allocation6], 1 }
  0x28   :  { %130 = vsyncpa [#allocation9], 1 }
  0x29   :  { %131 = vsyncpa [#allocation7], 1 }

</bundles_post_ra>
